<compile_context>
chip_gen: v7x
topology: tpu7x:2x2x1
jax: 0.10.0
libtpu: 0.0.40
codegen_flags: <defaults>
</compile_context>

<pallas_src>
import functools

import jax
import jax.numpy as jnp
from jax import lax
from jax.experimental import pallas as pl
from jax.experimental.pallas import tpu as pltpu

_MIB = 1024 * 1024


def _query_vmem_bytes():
    """Physical VMEM per TensorCore; conservative 64 MiB (v7x) if unknown."""
    vmem = 64 * _MIB
    try:
        info = pltpu.get_tpu_info()
        for attr in ("vmem_capacity_bytes", "vmem_size_bytes", "vmem_bytes"):
            val = getattr(info, attr, None)
            if val:
                vmem = int(val)
                break
    except Exception:
        pass
    return max(32 * _MIB, min(vmem, 128 * _MIB))


def _largest_divisor_leq(n, cap):
    cap = max(1, min(n, cap))
    for d in range(cap, 0, -1):
        if n % d == 0:
            return d
    return 1


def _pick_row_tile(rows, cap):
    cap = max(8, min(rows, cap))
    if cap >= rows:
        return rows
    for t in range(cap - cap % 8, 7, -8):
        if rows % t == 0:
            return t
    return rows  # no multiple-of-8 divisor <= cap; fall back to a single block


def _select_batch_block(B, N, C, mm_bytes, vmem_budget, min_steps):
    """Largest Bt (divisor of B) whose kernel-1 working set fits the VMEM budget."""
    weight_bytes = 3 * C * C * mm_bytes                    # wqkv, single buffer
    io_per_batch = 2 * (N * C * mm_bytes) + 2 * (C * N * mm_bytes)  # x + yt, 2 bufs each
    work_per_batch = (3 * N * C * mm_bytes                 # q, k, v in mm_dtype
                      + N * C * 4                          # one f32 projection in flight
                      + 2 * N * N * 4                      # s and p in f32
                      + N * N * mm_bytes                   # p cast for the MXU
                      + C * N * 4)                         # f32 attn@v result
    per_batch = io_per_batch + work_per_batch
    avail = max(vmem_budget - weight_bytes, per_batch)
    bt_vmem = max(1, avail // per_batch)
    bt_rows = max(1, 2048 // max(N, 1))                    # rows per grid step cap
    bt_steps = max(1, B // min_steps)                      # keep >= min_steps grid steps
    return _largest_divisor_leq(B, min(bt_vmem, bt_rows, bt_steps))


def _select_row_tile(R, C, mm_bytes, out_bytes, vmem_budget, min_steps):
    """Row tile for the projection kernel: big, but >= min_steps grid steps."""
    weight_bytes = C * C * mm_bytes + C * 4                # w_proj + bias, single buffer
    per_row = 2 * C * mm_bytes + 2 * C * out_bytes + C * 4  # z/out double-buffered + f32 acc
    avail = max(vmem_budget - weight_bytes, 8 * per_row)
    tm_vmem = max(8, (avail // per_row) // 8 * 8)
    cap = min(tm_vmem, 2048)
    if min_steps >= 2 and R >= 16:
        cap = min(cap, max(8, R // 2))
    return _pick_row_tile(R, cap)


def _attn_kernel(x_ref, wqkv_ref, yt_ref, *, scale, mm_dtype, approx_recip):
    """Fused qkv projection + scores + softmax + attn@v for one batch block.

    x_ref:    (Bt, N, C)  input block (mm_dtype)
    wqkv_ref: (3C, C)     qkv weight in PyTorch (out, in) layout (mm_dtype)
    yt_ref:   (Bt, C, N)  attention output, already transposed per batch elem
    """
    bt, n, c = x_ref.shape
    x2 = x_ref[...].reshape(bt * n, c)          # all rows of the block -> one MXU M dim

    # x @ W^T directly in the (out, in) weight layout: contract last axes.
    dn_rows = (((1,), (1,)), ((), ()))
    # Softmax scale folded into q (Bt*N*C elements instead of Bt*N*N scores);
    # cast q/k/v once at creation so only one precision of each stays live.
    q = (lax.dot_general(x2, wqkv_ref[0:c, :], dn_rows,
                         preferred_element_type=jnp.float32)
         * scale).astype(mm_dtype).reshape(bt, n, c)
    k = lax.dot_general(x2, wqkv_ref[c:2 * c, :], dn_rows,
                        preferred_element_type=jnp.float32
                        ).astype(mm_dtype).reshape(bt, n, c)
    v = lax.dot_general(x2, wqkv_ref[2 * c:3 * c, :], dn_rows,
                        preferred_element_type=jnp.float32
                        ).astype(mm_dtype).reshape(bt, n, c)

    # scores: s[b, i, j] = q[b, i, :] . k[b, j, :]  (MXU absorbs the transpose)
    s = lax.dot_general(q, k, (((2,), (2,)), ((0,), (0,))),
                        preferred_element_type=jnp.float32)              # (bt, n, n) f32

    # numerically stable softmax; elementwise math stays f32.
    m = jnp.max(s, axis=-1, keepdims=True)
    p = jnp.exp(s - m)
    linv = pl.reciprocal(jnp.sum(p, axis=-1), approx=approx_recip)       # (bt, n)
    p = p.astype(mm_dtype)                                               # drop f32 copy

    # attention output produced directly transposed:
    #   yt[b, c, i] = sum_k v[b, k, c] * p[b, i, k]
    yt = lax.dot_general(v, p, (((1,), (2,)), ((0,), (0,))),
                         preferred_element_type=jnp.float32)             # (bt, c, n)
    yt_ref[...] = (yt * linv[:, None, :]).astype(yt_ref.dtype)


def _proj_kernel(z_ref, wp_ref, b_ref, o_ref):
    """Output projection on a (TM, C) row block: z @ Wproj^T + b."""
    o = lax.dot_general(z_ref[...], wp_ref[...], (((1,), (1,)), ((), ())),
                        preferred_element_type=jnp.float32)
    o_ref[...] = (o + b_ref[...]).astype(o_ref.dtype)


def attention_forward(x, w_qkv, w_proj, b_proj, *, num_heads=8, qk_scale=None,
                      matmul_dtype=jnp.bfloat16, approx_reciprocal=True):
    """x: (B, N, C). w_qkv: (3C, C), w_proj: (C, C) in PyTorch nn.Linear (out, in)
    layout; b_proj: (C,). Returns (B, N, C) in x.dtype."""
    B, N, C = x.shape
    head_dim = C // num_heads
    scale = float(qk_scale) if qk_scale is not None else float(head_dim) ** (-0.5)
    out_dtype = x.dtype
    mm_dtype = jnp.dtype(matmul_dtype) if matmul_dtype is not None else jnp.dtype(jnp.float32)
    if x.dtype != mm_dtype:
        x = x.astype(mm_dtype)
    if w_qkv.dtype != mm_dtype:
        w_qkv = w_qkv.astype(mm_dtype)
    if w_proj.dtype != mm_dtype:
        w_proj = w_proj.astype(mm_dtype)
    b_proj = b_proj.astype(jnp.float32)

    mm_bytes = jnp.dtype(mm_dtype).itemsize
    out_bytes = jnp.dtype(out_dtype).itemsize

    # Generation-aware VMEM budget: ~60% of physical VMEM for blocks/intermediates,
    # explicit vmem_limit_bytes above the default scoped limit, >= 2 grid steps so
    # the "parallel" axis can use both v7x TensorCores.
    vmem_phys = _query_vmem_bytes()
    vmem_budget = int(0.60 * vmem_phys)
    vmem_limit = int(0.85 * vmem_phys)
    min_steps = 2 if B >= 2 else 1

    # ---- kernel 1: fused qkv + attention; output is pre-transposed (B, C, N) ----
    Bt = _select_batch_block(B, N, C, mm_bytes, vmem_budget, min_steps)
    yt = pl.pallas_call(
        functools.partial(_attn_kernel, scale=scale, mm_dtype=mm_dtype,
                          approx_recip=approx_reciprocal),
        out_shape=jax.ShapeDtypeStruct((B, C, N), mm_dtype),
        grid_spec=pltpu.PrefetchScalarGridSpec(
            num_scalar_prefetch=0,
            grid=(B // Bt,),
            in_specs=[
                pl.BlockSpec((Bt, N, C), lambda i: (i, 0, 0)),
                # Constant weight block: single buffer (no pointless double-buffering).
                pl.BlockSpec((3 * C, C), lambda i: (0, 0),
                             pipeline_mode=pl.Buffered(1)),
            ],
            out_specs=pl.BlockSpec((Bt, C, N), lambda i: (i, 0, 0)),
        ),
        compiler_params=pltpu.CompilerParams(
            dimension_semantics=("parallel",),
            vmem_limit_bytes=vmem_limit),
    )(x, w_qkv)

    # PyTorch's (attn @ v).transpose(1, 2).reshape(B, N, C): yt already holds the
    # per-batch transposed matrices, so the shuffle is a pure row-major
    # reinterpretation -- a free bitcast, no HBM traffic, no extra kernel.
    z = yt.reshape(B * N, C)

    # ---- kernel 2: output projection + bias over row blocks of (B*N, C) ----
    R = B * N
    TM = _select_row_tile(R, C, mm_bytes, out_bytes, vmem_budget, min_steps)
    out2 = pl.pallas_call(
        _proj_kernel,
        out_shape=jax.ShapeDtypeStruct((R, C), out_dtype),
        grid_spec=pltpu.PrefetchScalarGridSpec(
            num_scalar_prefetch=0,
            grid=(R // TM,),
            in_specs=[
                pl.BlockSpec((TM, C), lambda i: (i, 0)),
                pl.BlockSpec((C, C), lambda i: (0, 0),
                             pipeline_mode=pl.Buffered(1)),
                pl.BlockSpec((1, C), lambda i: (0, 0),
                             pipeline_mode=pl.Buffered(1)),
            ],
            out_specs=pl.BlockSpec((TM, C), lambda i: (i, 0)),
        ),
        compiler_params=pltpu.CompilerParams(
            dimension_semantics=("parallel",),
            vmem_limit_bytes=vmem_limit),
    )(z, w_proj, b_proj.reshape(1, C))

    return out2.reshape(B, N, C)


def attention_reference(x, w_qkv, w_proj, b_proj, *, num_heads=8, qk_scale=None):
    """Pure-JAX mirror of the PyTorch forward, for verification."""
    B, N, C = x.shape
    scale = qk_scale if qk_scale is not None else (C // num_heads) ** (-0.5)
    qkv = x @ w_qkv.T                                   # (B, N, 3C), qkv_bias=False
    q, k, v = qkv[..., :C], qkv[..., C:2 * C], qkv[..., 2 * C:]
    attn = jnp.einsum('bnc,bmc->bnm', q, k) * scale
    attn = jax.nn.softmax(attn, axis=-1)
    y = jnp.einsum('bnm,bmc->bnc', attn, v)
    y = jnp.transpose(y, (0, 2, 1)).reshape(B, N, C)
    return y @ w_proj.T + b_proj


if __name__ == "__main__":
    # Keep the pure-JAX reference in true f32 so the strict comparison is meaningful.
    jax.config.update("jax_default_matmul_precision", "highest")

    B, N, C = 2, 8, 32       # dim=32, num_heads=8 -> head_dim=4, scale=0.5
    num_heads = 8

    key = jax.random.PRNGKey(0)
    kx, kq, kp, kb = jax.random.split(key, 4)
    x = jax.random.normal(kx, (B, N, C), dtype=jnp.float32)
    # Deterministic synthetic parameters (PyTorch nn.Linear layout: (out, in))
    w_qkv = 0.05 * jax.random.normal(kq, (3 * C, C), dtype=jnp.float32)   # qkv_bias=False
    w_proj = 0.05 * jax.random.normal(kp, (C, C), dtype=jnp.float32)
    b_proj = 0.05 * jax.random.normal(kb, (C,), dtype=jnp.float32)

    ref = attention_reference(x, w_qkv, w_proj, b_proj, num_heads=num_heads)

    # 1) Exact-math path (f32 matmuls, exact reciprocal): tight tolerance.
    out_f32 = attention_forward(x, w_qkv, w_proj, b_proj, num_heads=num_heads,
                                matmul_dtype=jnp.float32, approx_reciprocal=False)
    out_f32 = jax.block_until_ready(out_f32)
    assert out_f32.shape == (B, N, C), out_f32.shape
    err_f32 = float(jnp.max(jnp.abs(out_f32 - ref)))
    assert jnp.allclose(out_f32, ref, rtol=1e-4, atol=1e-4), err_f32

    # 2) Production defaults (bf16 matmuls + approx reciprocal): loose tolerance.
    out_bf16 = attention_forward(x, w_qkv, w_proj, b_proj, num_heads=num_heads)
    out_bf16 = jax.block_until_ready(out_bf16)
    assert out_bf16.shape == (B, N, C), out_bf16.shape
    err_bf16 = float(jnp.max(jnp.abs(out_bf16 - ref)))
    assert jnp.allclose(out_bf16, ref, rtol=5e-2, atol=5e-2), err_bf16

    print("KERNEL_OK")
</pallas_src>

<mosaic_0001>
module attributes {stable_mosaic.version = 11 : i64} {
  func.func @_attn_kernel(%arg0: i32, %arg1: memref<1x8x32xf32, #tpu.memory_space<vmem>>, %arg2: memref<96x32xf32, #tpu.memory_space<vmem>>, %arg3: memref<1x32x8xf32, #tpu.memory_space<vmem>>) attributes {dimension_semantics = [#tpu.dimension_semantics<parallel>], iteration_bounds = array<i64: 2>, scalar_prefetch = 0 : i64, scratch_operands = 0 : i64, tpu.core_type = #tpu.core_type<tc>, window_params = [{transform_indices = @transform_0, window_bounds = array<i64: 1, 8, 32>}, {pipeline_mode = #tpu.pipeline_mode<synchronous>, transform_indices = @transform_1, window_bounds = array<i64: 96, 32>}, {transform_indices = @transform_2, window_bounds = array<i64: 1, 32, 8>}]} {
    %c0 = arith.constant 0 : index
    %c0_0 = arith.constant 0 : index
    %c0_1 = arith.constant 0 : index
    %0 = vector.load %arg1[%c0, %c0_0, %c0_1] : memref<1x8x32xf32, #tpu.memory_space<vmem>>, vector<1x8x32xf32>
    %1 = vector.shape_cast %0 : vector<1x8x32xf32> to vector<8x32xf32>
    %c0_2 = arith.constant 0 : index
    %c0_3 = arith.constant 0 : index
    %2 = vector.load %arg2[%c0_2, %c0_3] : memref<96x32xf32, #tpu.memory_space<vmem>>, vector<32x32xf32>
    %cst = arith.constant dense<0.000000e+00> : vector<8x32xf32>
    %3 = tpu.matmul %1, %2, %cst {dimension_numbers = #tpu.dot_dimension_numbers<[1], [1], [0], [0], [0, 0, 1, 0], [], []>, precision = #tpu.contract_precision<fp32>} : vector<8x32xf32>, vector<32x32xf32>, vector<8x32xf32> -> vector<8x32xf32>
    %cst_4 = arith.constant 5.000000e-01 : f32
    %4 = vector.broadcast %cst_4 : f32 to vector<8x32xf32>
    %5 = arith.mulf %3, %4 : vector<8x32xf32>
    %6 = vector.shape_cast %5 : vector<8x32xf32> to vector<1x8x32xf32>
    %c32 = arith.constant 32 : index
    %c0_5 = arith.constant 0 : index
    %7 = vector.load %arg2[%c32, %c0_5] : memref<96x32xf32, #tpu.memory_space<vmem>>, vector<32x32xf32>
    %cst_6 = arith.constant dense<0.000000e+00> : vector<8x32xf32>
    %8 = tpu.matmul %1, %7, %cst_6 {dimension_numbers = #tpu.dot_dimension_numbers<[1], [1], [0], [0], [0, 0, 1, 0], [], []>, precision = #tpu.contract_precision<fp32>} : vector<8x32xf32>, vector<32x32xf32>, vector<8x32xf32> -> vector<8x32xf32>
    %9 = vector.shape_cast %8 : vector<8x32xf32> to vector<1x8x32xf32>
    %c64 = arith.constant 64 : index
    %c0_7 = arith.constant 0 : index
    %10 = vector.load %arg2[%c64, %c0_7] : memref<96x32xf32, #tpu.memory_space<vmem>>, vector<32x32xf32>
    %cst_8 = arith.constant dense<0.000000e+00> : vector<8x32xf32>
    %11 = tpu.matmul %1, %10, %cst_8 {dimension_numbers = #tpu.dot_dimension_numbers<[1], [1], [0], [0], [0, 0, 1, 0], [], []>, precision = #tpu.contract_precision<fp32>} : vector<8x32xf32>, vector<32x32xf32>, vector<8x32xf32> -> vector<8x32xf32>
    %12 = vector.shape_cast %11 : vector<8x32xf32> to vector<1x8x32xf32>
    %cst_9 = arith.constant dense<0.000000e+00> : vector<1x8x8xf32>
    %13 = tpu.matmul %6, %9, %cst_9 {dimension_numbers = #tpu.dot_dimension_numbers<[2], [2], [1], [1], [0, 0, 0, 1, 1, 1], [0], [0]>, precision = #tpu.contract_precision<fp32>} : vector<1x8x32xf32>, vector<1x8x32xf32>, vector<1x8x8xf32> -> vector<1x8x8xf32>
    %cst_10 = arith.constant dense<0xFF800000> : vector<1x8xf32>
    %14 = vector.multi_reduction <maximumf>, %13, %cst_10 [2] : vector<1x8x8xf32> to vector<1x8xf32>
    %15 = vector.shape_cast %14 : vector<1x8xf32> to vector<1x8x1xf32>
    %16 = vector.broadcast %15 : vector<1x8x1xf32> to vector<1x8x8xf32>
    %17 = arith.subf %13, %16 : vector<1x8x8xf32>
    %18 = math.exp %17 : vector<1x8x8xf32>
    %cst_11 = arith.constant dense<0.000000e+00> : vector<1x8xf32>
    %19 = vector.multi_reduction <add>, %18, %cst_11 [2] : vector<1x8x8xf32> to vector<1x8xf32>
    %20 = tpu.reciprocal %19 : vector<1x8xf32> -> vector<1x8xf32>
    %cst_12 = arith.constant dense<0.000000e+00> : vector<1x32x8xf32>
    %21 = tpu.matmul %12, %18, %cst_12 {dimension_numbers = #tpu.dot_dimension_numbers<[1], [2], [2], [1], [0, 0, 0, 2, 1, 1], [0], [0]>, precision = #tpu.contract_precision<fp32>} : vector<1x8x32xf32>, vector<1x8x8xf32>, vector<1x32x8xf32> -> vector<1x32x8xf32>
    %22 = vector.shape_cast %20 : vector<1x8xf32> to vector<1x1x8xf32>
    %23 = vector.broadcast %22 : vector<1x1x8xf32> to vector<1x32x8xf32>
    %24 = arith.mulf %21, %23 : vector<1x32x8xf32>
    %c0_13 = arith.constant 0 : index
    %c0_14 = arith.constant 0 : index
    %c0_15 = arith.constant 0 : index
    %25 = vector.load %arg3[%c0_13, %c0_14, %c0_15] : memref<1x32x8xf32, #tpu.memory_space<vmem>>, vector<1x32x8xf32>
    tpu.vector_store %arg3[%c0_13, %c0_14, %c0_15], %24 {strides = array<i32>} : memref<1x32x8xf32, #tpu.memory_space<vmem>>, vector<1x32x8xf32>,
    return
  }
  func.func @transform_0(%arg0: i32) -> (i32, i32, i32) {
    %c0_i32 = arith.constant 0 : i32
    %c0_i32_0 = arith.constant 0 : i32
    %c0_i32_1 = arith.constant 0 : i32
    return %arg0, %c0_i32, %c0_i32_0 : i32, i32, i32
  }
  func.func @transform_1(%arg0: i32) -> (i32, i32) {
    %c0_i32 = arith.constant 0 : i32
    %c0_i32_0 = arith.constant 0 : i32
    %c0_i32_1 = arith.constant 0 : i32
    return %c0_i32, %c0_i32_0 : i32, i32
  }
  func.func @transform_2(%arg0: i32) -> (i32, i32, i32) {
    %c0_i32 = arith.constant 0 : i32
    %c0_i32_0 = arith.constant 0 : i32
    %c0_i32_1 = arith.constant 0 : i32
    return %arg0, %c0_i32, %c0_i32_0 : i32, i32, i32
  }
}

</mosaic_0001>

<bundles_post_ra>
// kernel: tpu_custom_call.1
= control target key start
LH: loop header
LB: loop body
LE: loop exit
PB: predicated region body
PF: predicated region fallthrough
CT: control target
= control target key end

     0   :  { %s3444_s9 = smov 0   ;;  %s3744_s0 = inlined_call_operand.vmem [shape: f32[2,8,32], index: 0, kind: input, shape index: {}]   ;;  %s3745_s1 = inlined_call_operand.vmem [shape: f32[96,32], index: 1, kind: input, shape index: {}]   ;;  %s3746_s2 = inlined_call_operand.vmem [shape: f32[2,32,8], index: 2, kind: output, shape index: {}]  }
   0x1 LB: > { %s2818_s10 = sadd.s32 4294967295, %s3424_s9   ;;  %p2822_p0 = scmp.ge.s32.totalorder %s3424_s9, 1  ;;  %s3424_s9 = sphi %s3444_s9, %s12_s9  }
   0x2   : > { %p111_p1 = scmp.lt.s32.totalorder %s3424_s9, 3 }
   0x4   : > { %p112_p2 = pnand %p2822_p0, %p111_p1 }
   0x5   : > { %v142_v0 = vld [vmem:[%s3745_s1] sm:$0xff] (!%p112_p2)  ;;  %v143_v1 = vld [vmem:[%s3745_s1 + $0x8] sm:$0xff] (!%p112_p2)  ;;  %vm146_vm0 = vcmask (!%p112_p2), 261120   ;;  %v144_v2 = vld [vmem:[%s3745_s1 + $0x10] sm:$0xff] (!%p112_p2)  ;;  %v3426_v3 = vmov (!%p112_p2), 0.0|0.0   ;;  %p132_p3 = scmp.lt.s32.totalorder (!%p112_p2), %s2818_s10, 1 }
   0x6   : > { %115 = sbr.rel (%p112_p2) target bundleno = 1050 (0x41a), region = 28  ;;  %3237 = vmatprep.subr.bf16.mxu1 (!%p112_p2), %v3426_v3  ;;  %v151_v4 = vsel (!%p112_p2), %vm146_vm0, %v142_v0, 0  ;;  %v154_v5 = vsel (!%p112_p2), %vm146_vm0, %v143_v1, 0  ;;  %3243 = vmatprep.subr.bf16.mxu0 (!%p112_p2), %v3426_v3  ;;  %v145_v6 = vld [vmem:[%s3745_s1 + $0x18] sm:$0xff] (!%p112_p2)  ;;  %v157_v7 = vsel (!%p112_p2), %vm146_vm0, %v144_v2, 0  ;;  %vm3427_vm1 = vmmov (!%p112_p2), 0  }
   0x7   : > { %v163_v8 = vand.u32 (!%p112_p2), 4294901760, %v151_v4  ;;  %v166_v9 = vand.u32 (!%p112_p2), 4294901760, %v154_v5  ;;  %v160_v10 = vsel (!%p112_p2), %vm146_vm0, %v145_v6, 0  ;;  %v169_v11 = vand.u32 (!%p112_p2), 4294901760, %v157_v7  ;;  %v648_v27 = vld [vmem:[%s3745_s1 + $0x20] sm:$0xff] (!%p112_p2)  ;;  %v649_v28 = vld [vmem:[%s3745_s1 + $0x28] sm:$0xff] (!%p112_p2) }
   0x8   : > { %v3428_v12 = vmov (!%p112_p2), 0.0   ;;  %v172_v13 = vand.u32 (!%p112_p2), 4294901760, %v160_v10  ;;  %v653_v36 = vsel (!%p112_p2), %vm146_vm0, %v648_v27, 0  ;;  %v656_v37 = vsel (!%p112_p2), %vm146_vm0, %v649_v28, 0  ;;  %v650_v45 = vld [vmem:[%s3745_s1 + $0x30] sm:$0xff] (!%p112_p2)  ;;  %v651_v46 = vld [vmem:[%s3745_s1 + $0x38] sm:$0xff] (!%p112_p2) }
   0x9   : > { %2969 = vmatprep.mubr.msk.f32.mxu1 (!%p112_p2), %vm3427_vm1, %v3428_v12  ;;  %2980 = vmatprep.mubr.msk.f32.mxu0 (!%p112_p2), %vm3427_vm1, %v3428_v12  ;;  %v3476_v14 = vpack.c.bf16 (!%p112_p2), %v166_v9, %v163_v8  ;;  %v3478_v15 = vsub.f32 (!%p112_p2), %v151_v4, %v163_v8  ;;  %v3480_v16 = vsub.f32 (!%p112_p2), %v154_v5, %v166_v9  ;;  %v665_v42 = vand.u32 (!%p112_p2), 4294901760, %v653_v36 }
   0xa   : > { %v3482_v17 = vsub.f32 (!%p112_p2), %v157_v7, %v169_v11  ;;  %v3484_v18 = vsub.f32 (!%p112_p2), %v160_v10, %v172_v13  ;;  %v3509_v29 = vpack.c.bf16 (!%p112_p2), %v172_v13, %v169_v11  ;;  %v668_v43 = vand.u32 (!%p112_p2), 4294901760, %v656_v37 }
   0xb   : > { %3239 = vmatpush3.bf16.xpose.msra.mxu1 (!%p112_p2), %v3476_v14  ;;  %v244_v19 = vand.u32 (!%p112_p2), 4294901760, %v3478_v15  ;;  %v251_v20 = vand.u32 (!%p112_p2), 4294901760, %v3480_v16  ;;  %v3542_v50 = vsub.f32 (!%p112_p2), %v653_v36, %v665_v42  ;;  %v659_v52 = vsel (!%p112_p2), %vm146_vm0, %v650_v45, 0 }
   0xc   : > { %v258_v21 = vand.u32 (!%p112_p2), 4294901760, %v3482_v17  ;;  %3240 = vmatprep.subr.bf16.mxu1 (!%p112_p2), %v3426_v3  ;;  %v265_v23 = vand.u32 (!%p112_p2), 4294901760, %v3484_v18  ;;  %v3540_v49 = vpack.c.bf16 (!%p112_p2), %v668_v43, %v665_v42  ;;  %v3544_v51 = vsub.f32 (!%p112_p2), %v656_v37, %v668_v43 }
   0xd   : > { %s3748_s10 = smov (!%p132_p3, %s2818_s10), 1  ;;  %v245_v24 = vsub.f32 %v3478_v15, %v244_v19  ;;  %v252_v25 = vsub.f32 %v3480_v16, %v251_v20  ;;  %v662_v53 = vsel %vm146_vm0, %v651_v46, 0  ;;  %v671_v54 = vand.u32 4294901760, %v659_v52 }
   0xe   : > { %s2823_s19 = sshll.u32 %s3748_s10, 3  ;;  %v259_v33 = vsub.f32 %v3482_v17, %v258_v21  ;;  %v266_v34 = vsub.f32 %v3484_v18, %v265_v23  ;;  %v674_v55 = vand.u32 4294901760, %v662_v53  ;;  %v746_v56 = vand.u32 4294901760, %v3542_v50  ;;  %s2828_s13 = sshll.u32 %s3748_s10, 5 }
   0xf   : > { %s135_s22 = scalar_lea.vmem %s3744_s0, %s2823_s19  ;;  %v246_v31 = vand.u32 4294901760, %v245_v24  ;;  %v253_v32 = vand.u32 4294901760, %v252_v25  ;;  %v753_v57 = vand.u32 4294901760, %v3544_v51  ;;  %v3250_v58 = vpack.c.bf16 %v3480_v16, %v3478_v15  ;;  %v1149_v16 = vld [vmem:[%s3745_s1 + $0x40] sm:$0xff]  ;;  %v1152_v25 = vld [vmem:[%s3745_s1 + $0x58] sm:$0xff]  ;;  %s140_s16 = scalar_lea.vmem %s3746_s2, %s2828_s13 }
  0x10   : > { %v141_v22 = vld [vmem:[%s135_s22] sm:$0xff]  ;;  %v260_v40 = vand.u32 4294901760, %v259_v33  ;;  %v267_v41 = vand.u32 4294901760, %v266_v34  ;;  %v3558_v59 = vsub.f32 %v659_v52, %v671_v54  ;;  %v3560_v60 = vpack.c.bf16 %v674_v55, %v671_v54 }
  0x11   : > { %v148_v26 = vsel %vm146_vm0, %v141_v22, 0  ;;  %v3244_v38 = vpack.c.bf16 %v253_v32, %v246_v31  ;;  %v3562_v61 = vsub.f32 %v662_v53, %v674_v55  ;;  %v747_v62 = vsub.f32 %v3542_v50, %v746_v56 }
  0x12   : > { %v3511_v30 = vand.u32 4294901760, %v148_v26  ;;  %v3247_v48 = vpack.c.bf16 %v267_v41, %v260_v40  ;;  %v754_v63 = vsub.f32 %v3544_v51, %v753_v57  ;;  %v760_v2 = vand.u32 4294901760, %v3558_v59 }
  0x13   : > { %3242 = vmatpush3.bf16.xpose.msra.mxu1 %v3509_v29  ;;  %3245 = vmatpush3.bf16.xpose.msra.mxu0 %v3244_v38  ;;  %v748_v0 = vand.u32 4294901760, %v747_v62  ;;  %v767_v4 = vand.u32 4294901760, %v3562_v61  ;;  %v3253_v5 = vpack.c.bf16 %v3484_v18, %v3482_v17  ;;  %v3286_v13 = vpack.c.bf16 %v3544_v51, %v3542_v50  ;;  %v1150_v17 = vld [vmem:[%s3745_s1 + $0x48] sm:$0xff] }
  0x14   : > { %v3520_v35 = vsub.f32 %v148_v26, %v3511_v30  ;;  %3246 = vmatprep.subr.bf16.mxu0 %v3426_v3  ;;  %3273 = vmatprep.subr.bf16.mxu1 %v3426_v3  ;;  %v755_v1 = vand.u32 4294901760, %v754_v63  ;;  %v761_v7 = vsub.f32 %v3558_v59, %v760_v2  ;;  %v3262_v22 = vpack.c.bf16 %v251_v20, %v244_v19 }
  0x15   : > { %v768_v8 = vsub.f32 %v3562_v61, %v767_v4  ;;  %v3289_v24 = vpack.c.bf16 %v3562_v61, %v3558_v59  ;;  %v3265_v15 = vpack.c.bf16 %v265_v23, %v258_v21  ;;  %v1154_v18 = vsel %vm146_vm0, %v1149_v16, 0  ;;  %v1151_v23 = vld [vmem:[%s3745_s1 + $0x50] sm:$0xff] }
  0x16   : > { %v3525_v39 = vand.u32 4294901760, %v3520_v35  ;;  %v3280_v6 = vpack.c.bf16 %v755_v1, %v748_v0  ;;  %v762_v9 = vand.u32 4294901760, %v761_v7  ;;  %v1157_v19 = vsel %vm146_vm0, %v1150_v17, 0 }
  0x17   : > { %v769_v10 = vand.u32 4294901760, %v768_v8  ;;  %v1166_v20 = vand.u32 4294901760, %v1154_v18  ;;  %v1169_v21 = vand.u32 4294901760, %v1157_v19  ;;  %v3301_v26 = vpack.c.bf16 %v767_v4, %v760_v2 }
  0x18   : > { %v234_v44 = vsub.f32 %v3520_v35, %v3525_v39  ;;  %v1160_v31 = vsel %vm146_vm0, %v1151_v23, 0  ;;  %v1163_v32 = vsel %vm146_vm0, %v1152_v25, 0  ;;  %vm2102_vm2 = vcmask 64512  }
  0x19   : > { %v3283_v11 = vpack.c.bf16 %v769_v10, %v762_v9  ;;  %v3661_v27 = vpack.c.bf16 %v1169_v21, %v1166_v20  ;;  %v1246_v28 = vsub.f32 %v1154_v18, %v1166_v20  ;;  %v1172_v33 = vand.u32 4294901760, %v1160_v31 }
  0x1a   : > { %v3538_v47 = vand.u32 4294901760, %v234_v44  ;;  %v1175_v34 = vand.u32 4294901760, %v1163_v32 }
  0x1b   : > { %3248 = vmatpush3.bf16.xpose.msra.mxu0 %v3247_v48  ;;  %v1247_v36 = vand.u32 4294901760, %v1246_v28  ;;  %v1260_v38 = vsub.f32 %v1160_v31, %v1172_v33 }
  0x1c   : > { %2970 = vmatmul.mubr.f32.vlgmr.msra.gmra.mrb[0].mxu1 %v3538_v47  ;;  %3249 = vmatprep.subr.bf16.mxu0 %v3426_v3  ;;  %v3313_v40 = vpack.c.bf16 %v1175_v34, %v1172_v33  ;;  %v1267_v41 = vsub.f32 %v1163_v32, %v1175_v34 }
  0x1d   : > { %3275 = vmatpush3.bf16.xpose.msra.mxu1 %v3540_v49  ;;  %3035 = vmatprep.mubr.msk.f32.mxu1 %vm3427_vm1, %v3428_v12  ;;  %v1248_v42 = vsub.f32 %v1246_v28, %v1247_v36  ;;  %v1261_v46 = vand.u32 4294901760, %v1260_v38 }
  0x1e   : > { %3276 = vmatprep.subr.bf16.mxu1 %v3426_v3  ;;  %v1268_v48 = vand.u32 4294901760, %v1267_v41  ;;  %v3325_v55 = vpack.c.bf16 %v1267_v41, %v1260_v38 }
  0x1f   : > { %v1249_v44 = vand.u32 4294901760, %v1248_v42  ;;  %v1262_v51 = vsub.f32 %v1260_v38, %v1261_v46 }
  0x20   : > { %v1269_v52 = vsub.f32 %v1267_v41, %v1268_v48 }
  0x22   : > { %2981 = vmatmul.mubr.f32.vlgmr.msra.gmra.mrb[0].mxu0 %v3511_v30  ;;  %v1270_v53 = vand.u32 4294901760, %v1269_v52 }
  0x23   : > { %3251 = vmatpush3.bf16.xpose.msra.mxu0 %v3250_v58  ;;  %2991 = vmatprep.mubr.msk.f32.mxu0 %vm3427_vm1, %v3428_v12 }
  0x24   : > { %3252 = vmatprep.subr.bf16.mxu0 %v3426_v3 }
  0x25   : > { %3278 = vmatpush3.bf16.xpose.msra.mxu1 %v3560_v60 }
  0x26   : > { %3279 = vmatprep.subr.bf16.mxu1 %v3426_v3 }
  0x2b   : > { %3254 = vmatpush3.bf16.xpose.msra.mxu0 %v3253_v5 }
  0x2c   : > { %3036 = vmatmul.mubr.f32.vlgmr.msra.gmra.mrb[2].mxu1 %v3538_v47  ;;  %3255 = vmatprep.subr.bf16.mxu0 %v3426_v3 }
  0x2d   : > { %3281 = vmatpush3.bf16.xpose.msra.mxu1 %v3280_v6  ;;  %3046 = vmatprep.mubr.msk.f32.mxu1 %vm3427_vm1, %v3428_v12 }
  0x2e   : > { %3282 = vmatprep.subr.bf16.mxu1 %v3426_v3 }
  0x32   : > { %2992 = vmatmul.mubr.f32.vlgmr.msra.gmra.mrb[0].mxu0 %v3520_v35 }
  0x33   : > { %3257 = vmatpush3.bf16.xpose.msra.mxu0 %v3476_v14  ;;  %3002 = vmatprep.mubr.msk.f32.mxu0 %vm3427_vm1, %v3428_v12 }
  0x34   : > { %3258 = vmatprep.subr.bf16.mxu0 %v3426_v3 }
  0x35   : > { %3284 = vmatpush3.bf16.xpose.msra.mxu1 %v3283_v11 }
  0x36   : > { %3285 = vmatprep.subr.bf16.mxu1 %v3426_v3 }
  0x3b   : > { %3260 = vmatpush3.bf16.xpose.msra.mxu0 %v3509_v29 }
  0x3c   : > { %3047 = vmatmul.mubr.f32.vlgmr.msra.gmra.mrb[2].mxu1 %v3511_v30  ;;  %3261 = vmatprep.subr.bf16.mxu0 %v3426_v3 }
  0x3d   : > { %3287 = vmatpush3.bf16.xpose.msra.mxu1 %v3286_v13  ;;  %3057 = vmatprep.mubr.msk.f32.mxu1 %vm3427_vm1, %v3428_v12 }
  0x3e   : > { %3288 = vmatprep.subr.bf16.mxu1 %v3426_v3 }
  0x42   : > { %3003 = vmatmul.mubr.f32.vlgmr.msra.gmra.mrb[0].mxu0 %v3525_v39 }
  0x43   : > { %3263 = vmatpush3.bf16.xpose.msra.mxu0 %v3262_v22  ;;  %3013 = vmatprep.mubr.msk.f32.mxu0 %vm3427_vm1, %v3428_v12 }
  0x44   : > { %3264 = vmatprep.subr.bf16.mxu0 %v3426_v3 }
  0x45   : > { %3290 = vmatpush3.bf16.xpose.msra.mxu1 %v3289_v24 }
  0x46   : > { %3291 = vmatprep.subr.bf16.mxu1 %v3426_v3 }
  0x4b   : > { %3266 = vmatpush3.bf16.xpose.msra.mxu0 %v3265_v15 }
  0x4c   : > { %3058 = vmatmul.mubr.f32.vlgmr.msra.gmra.mrb[2].mxu1 %v3520_v35  ;;  %3267 = vmatprep.subr.bf16.mxu0 %v3426_v3 }
  0x4d   : > { %3293 = vmatpush3.bf16.xpose.msra.mxu1 %v3540_v49  ;;  %3068 = vmatprep.mubr.msk.f32.mxu1 %vm3427_vm1, %v3428_v12 }
  0x4e   : > { %3294 = vmatprep.subr.bf16.mxu1 %v3426_v3 }
  0x52   : > { %3014 = vmatmul.mubr.f32.vlgmr.msra.gmra.mrb[0].mxu0 %v3511_v30 }
  0x53   : > { %3269 = vmatpush3.bf16.xpose.msra.mxu0 %v3476_v14  ;;  %3024 = vmatprep.mubr.msk.f32.mxu0 %vm3427_vm1, %v3428_v12  ;;  %v3298_v14 = vpack.c.bf16 %v753_v57, %v746_v56 }
  0x54   : > { %3270 = vmatprep.subr.bf16.mxu0 %v3426_v3 }
  0x55   : > { %3296 = vmatpush3.bf16.xpose.msra.mxu1 %v3560_v60 }
  0x56   : > { %3297 = vmatprep.subr.bf16.mxu1 %v3426_v3 }
  0x5b   : > { %3272 = vmatpush3.bf16.xpose.msra.mxu0 %v3509_v29  ;;  %v1253_v29 = vsub.f32 %v1157_v19, %v1169_v21 }
  0x5c   : > { %3069 = vmatmul.mubr.f32.vlgmr.msra.gmra.mrb[2].mxu1 %v3525_v39  ;;  %3309 = vmatprep.subr.bf16.mxu0 %v3426_v3 }
  0x5d   : > { %3299 = vmatpush3.bf16.xpose.msra.mxu1 %v3298_v14  ;;  %3079 = vmatprep.mubr.msk.f32.mxu1 %vm3427_vm1, %v3428_v12  ;;  %v1254_v37 = vand.u32 4294901760, %v1253_v29 }
  0x5e   : > { %3300 = vmatprep.subr.bf16.mxu1 %v3426_v3 }
  0x5f   : > { %v1255_v43 = vsub.f32 %v1253_v29, %v1254_v37  ;;  %v3334_v56 = vpack.c.bf16 %v1254_v37, %v1247_v36 }
  0x61   : > { %v1256_v45 = vand.u32 4294901760, %v1255_v43 }
  0x62   : > { %3025 = vmatmul.mubr.f32.vlgmr.msra.gmra.mrb[0].mxu0 %v3511_v30 }
  0x63   : > { %3311 = vmatpush3.bf16.xpose.msra.mxu0 %v3661_v27  ;;  %3101 = vmatprep.mubr.msk.f32.mxu0 %vm3427_vm1, %v3428_v12  ;;  %v3316_v50 = vpack.c.bf16 %v1256_v45, %v1249_v44 }
  0x64   : > { %3312 = vmatprep.subr.bf16.mxu0 %v3426_v3 }
  0x65   : > { %3302 = vmatpush3.bf16.xpose.msra.mxu1 %v3301_v26 }
  0x66   : > { %3303 = vmatprep.subr.bf16.mxu1 %v3426_v3 }
  0x6b   : > { %3314 = vmatpush3.bf16.xpose.msra.mxu0 %v3313_v40 }
  0x6c   : > { %3080 = vmatmul.mubr.f32.vlgmr.msra.gmra.mrb[2].mxu1 %v3511_v30  ;;  %3315 = vmatprep.subr.bf16.mxu0 %v3426_v3 }
  0x6d   : > { %3305 = vmatpush3.bf16.xpose.msra.mxu1 %v3540_v49  ;;  %3090 = vmatprep.mubr.msk.f32.mxu1 %vm3427_vm1, %v3428_v12  ;;  %v1263_v49 = vand.u32 4294901760, %v1262_v51 }
  0x6e   : > { %3306 = vmatprep.subr.bf16.mxu1 %v3426_v3 }
  0x6f   : > { %v3319_v54 = vpack.c.bf16 %v1270_v53, %v1263_v49 }
  0x72   : > { %3102 = vmatmul.mubr.f32.vlgmr.msra.gmra.mrb[2].mxu0 %v3538_v47  ;;  %v3322_v47 = vpack.c.bf16 %v1253_v29, %v1246_v28 }
  0x73   : > { %3317 = vmatpush3.bf16.xpose.msra.mxu0 %v3316_v50  ;;  %3112 = vmatprep.mubr.msk.f32.mxu0 %vm3427_vm1, %v3428_v12 }
  0x74   : > { %3318 = vmatprep.subr.bf16.mxu0 %v3426_v3 }
  0x75   : > { %3308 = vmatpush3.bf16.xpose.msra.mxu1 %v3560_v60 }
  0x76   : > { %3164 = vmatprep.subr.mxu1 %v3428_v12 }
  0x7b   : > { %3320 = vmatpush3.bf16.xpose.msra.mxu0 %v3319_v54 }
  0x7c   : > { %3091 = vmatmul.mubr.f32.vlgmr.msra.gmra.mrb[2].mxu1 %v3511_v30  ;;  %3321 = vmatprep.subr.bf16.mxu0 %v3426_v3 }
  0x7d   : > { %3166 = vmatprep.mubr.msk.f32.mxu1 %vm3427_vm1, %v3428_v12 }
  0x82   : > { %3113 = vmatmul.mubr.f32.vlgmr.msra.gmra.mrb[2].mxu0 %v3511_v30 }
  0x83   : > { %3323 = vmatpush3.bf16.xpose.msra.mxu0 %v3322_v47  ;;  %3123 = vmatprep.mubr.msk.f32.mxu0 %vm3427_vm1, %v3428_v12 }
  0x84   : > { %3324 = vmatprep.subr.bf16.mxu0 %v3426_v3 }
  0x8b   : > { %3326 = vmatpush3.bf16.xpose.msra.mxu0 %v3325_v55 }
  0x8c   : > { %3327 = vmatprep.subr.bf16.mxu0 %v3426_v3 }
  0x92   : > { %3124 = vmatmul.mubr.f32.vlgmr.msra.gmra.mrb[2].mxu0 %v3520_v35  ;;  %v3337_v35 = vpack.c.bf16 %v1268_v48, %v1261_v46 }
  0x93   : > { %3329 = vmatpush3.bf16.xpose.msra.mxu0 %v3661_v27  ;;  %3134 = vmatprep.mubr.msk.f32.mxu0 %vm3427_vm1, %v3428_v12 }
  0x94   : > { %3330 = vmatprep.subr.bf16.mxu0 %v3426_v3 }
  0x9b   : > { %3332 = vmatpush3.bf16.xpose.msra.mxu0 %v3313_v40 }
  0x9c   : > { %3333 = vmatprep.subr.bf16.mxu0 %v3426_v3 }
  0xa2   : > { %3135 = vmatmul.mubr.f32.vlgmr.msra.gmra.mrb[2].mxu0 %v3525_v39 }
  0xa3   : > { %3335 = vmatpush3.bf16.xpose.msra.mxu0 %v3334_v56  ;;  %3145 = vmatprep.mubr.msk.f32.mxu0 %vm3427_vm1, %v3428_v12 }
  0xa4   : > { %3336 = vmatprep.subr.bf16.mxu0 %v3426_v3 }
  0xab   : > { %3338 = vmatpush3.bf16.xpose.msra.mxu0 %v3337_v35 }
  0xac   : > { %3339 = vmatprep.subr.bf16.mxu0 %v3426_v3 }
  0xb2   : > { %3146 = vmatmul.mubr.f32.vlgmr.msra.gmra.mrb[2].mxu0 %v3511_v30 }
  0xb3   : > { %3341 = vmatpush3.bf16.xpose.msra.mxu0 %v3661_v27  ;;  %3156 = vmatprep.mubr.msk.f32.mxu0 %vm3427_vm1, %v3428_v12 }
  0xb4   : > { %3342 = vmatprep.subr.bf16.mxu0 %v3426_v3 }
  0xbb   : > { %3344 = vmatpush3.bf16.xpose.msra.mxu0 %v3313_v40 }
  0xbc   : > { %3159 = vmatprep.subr.mxu0 %v3428_v12 }
  0xc2   : > { %3157 = vmatmul.mubr.f32.vlgmr.msra.gmra.mrb[2].mxu0 %v3511_v30 }
  0xc3   : > { %3161 = vmatprep.mubr.msk.f32.mxu0 %vm3427_vm1, %v3428_v12 }
  0xef   : > { %v237_v39 = vpop.f32.mrb[0].mxu1 }
  0xf0   : > { %v2971_v57 = vpop.f32.mrb[1].mxu1 }
 0x135   : > { %v643_v58 = vpop.f32.mrb[0].mxu0 }
 0x136   : > { %v3345_v59 = vadd.f32 %v643_v58, %v237_v39  ;;  %v3026_v60 = vpop.f32.mrb[1].mxu0 }
 0x137   : > { %v2736_v60 = vlaneseq }
 0x138   : > { %v647_v61 = vmul.f32 0.5, %v3345_v59 }
 0x13a   : > { %v1651_v62 = vsel %vm146_vm0, %v647_v61, 0  ;;  %v2737_v61 = vand.u32 127, %v2736_v60 }
 0x13b   : > { %v1722_v63 = vand.u32 4294901760, %v1651_v62 }
 0x13d   : > { %v1723_v0 = vsub.f32 %v1651_v62, %v1722_v63  ;;  %v2739_v62 = vshrl.u32 %v2736_v60, 7 }
 0x13f   : > { %v1724_v1 = vand.u32 4294901760, %v1723_v0 }
 0x141   : > { %v1725_v5 = vsub.f32 %v1723_v0, %v1724_v1 }
 0x143   : > { %v1726_v7 = vand.u32 4294901760, %v1725_v5 }
 0x14f   : > { %v1145_v3 = vpop.f32.mrb[2].mxu1 }
 0x150   : > { %v1654_v2 = vsel %vm146_vm0, %v1145_v3, 0  ;;  %v3092_v4 = vpop.f32.mrb[3].mxu1 }
 0x151   : > { %v1657_v30 = vand.u32 4294901760, %v1654_v2 }
 0x153   : > { %v1734_v6 = vsub.f32 %v1654_v2, %v1657_v30  ;;  %3160 = vmatpush3.xpose.msra.mxu0 %v1657_v30 }
 0x155   : > { %v1735_v8 = vand.u32 4294901760, %v1734_v6 }
 0x156   : > { %3162 = vmatmul.mubr.f32.vlgmr.msra.gmra.mrb[4].mxu0 %v1726_v7 }
 0x157   : > { %v1736_v9 = vsub.f32 %v1734_v6, %v1735_v8 }
 0x159   : > { %v1737_v10 = vand.u32 4294901760, %v1736_v9 }
 0x15b   : > { %3165 = vmatpush3.xpose.msra.mxu1 %v1737_v10 }
 0x15c   : > { %3169 = vmatprep.subr.mxu1 %v3428_v12 }
 0x15e   : > { %3167 = vmatmul.mubr.f32.vlgmr.msra.gmra.mrb[4].mxu1 %v1722_v63 }
 0x15f   : > { %3170 = vmatpush3.xpose.msra.mxu1 %v1734_v6  ;;  %3171 = vmatprep.mubr.msk.f32.mxu1 %vm3427_vm1, %v3428_v12 }
 0x160   : > { %3174 = vmatprep.subr.mxu1 %v3428_v12 }
 0x166   : > { %3172 = vmatmul.mubr.f32.vlgmr.msra.gmra.mrb[4].mxu1 %v1723_v0 }
 0x167   : > { %3175 = vmatpush3.xpose.msra.mxu1 %v1657_v30  ;;  %3176 = vmatprep.mubr.msk.f32.mxu1 %vm3427_vm1, %v3428_v12 }
 0x168   : > { %3179 = vmatprep.subr.mxu1 %v3428_v12 }
 0x16e   : > { %3177 = vmatmul.mubr.f32.vlgmr.msra.gmra.mrb[4].mxu1 %v1724_v1 }
 0x16f   : > { %3180 = vmatpush3.xpose.msra.mxu1 %v1735_v8  ;;  %3181 = vmatprep.mubr.msk.f32.mxu1 %vm3427_vm1, %v3428_v12 }
 0x170   : > { %3184 = vmatprep.subr.mxu1 %v3428_v12 }
 0x176   : > { %3182 = vmatmul.mubr.f32.vlgmr.msra.gmra.mrb[4].mxu1 %v1722_v63 }
 0x177   : > { %3185 = vmatpush3.xpose.msra.mxu1 %v1657_v30  ;;  %3186 = vmatprep.mubr.msk.f32.mxu1 %vm3427_vm1, %v3428_v12 }
 0x17e   : > { %3187 = vmatmul.mubr.f32.vlgmr.msra.gmra.mrb[4].mxu1 %v1722_v63  ;;  %v2740_v63 = vsub.s32 %v2737_v61, %v2739_v62 }
 0x195   : > { %v1646_v11 = vpop.f32.mrb[2].mxu0 }
 0x196   : > { %v3158_v13 = vpop.f32.mrb[3].mxu0 }
 0x229   : > { %v1728_v22 = vpop.f32.mrb[4].mxu0 }
 0x22a   : > { %v3163_v24 = vpop.f32.mrb[5].mxu0 }
 0x251   : > { %v2098_v15 = vpop.f32.mrb[4].mxu1 }
 0x252   : > { %v3346_v16 = vadd.f32 %v2098_v15, %v1728_v22  ;;  %v3188_v17 = vpop.f32.mrb[5].mxu1 }
 0x254   : > { %v2103_v14 = vsel %vm2102_vm2, %v3346_v16, -inf }
 0x255   : > { %2104 = vmax.xlane.f32.xlu0 %v2103_v14 }
 0x282   : > { %2113 = vxpose.xlu0.b32.start.end [1/1] (short) (narrow) %v1646_v11, 32 }
 0x2e2   : > { %v2105_v18 = vpop.xlane.xlu0 %2104 }
 0x2e3   : > { %v2106_v19 = vsub.f32 %v3346_v16, %v2105_v18 }
 0x2e5   : > { %v2107_v20 = vmul.f32 1.442695, %v2106_v19 }
 0x2e7   : > { %3414 = vpow2.f32 %v2107_v20 }
 0x2f1   : > { %v3415_v21 = vpop.eup %3414 }
 0x2f2   : > { %v2158_v12 = vsel %vm2102_vm2, %v3415_v21, 0  ;;  %v2109_v23 = vsel %vm2102_vm2, %v3415_v21, 0.0 }
 0x2f3   : > { %v2161_v25 = vand.u32 4294901760, %v2158_v12  ;;  %2110 = vadd.xlane.f32.xlu1 %v2109_v23 }
 0x2f5   : > { %3189 = vmatprep.subr.mxu1 %v2161_v25  ;;  %v2268_v26 = vsub.f32 %v2158_v12, %v2161_v25 }
 0x2f6   : > { %3190 = vmatpush3.xpose.msra.mxu1 %v2161_v25 }
 0x2f7   : > { %v2269_v27 = vand.u32 4294901760, %v2268_v26 }
 0x2f9   : > { %v2270_v28 = vsub.f32 %v2268_v26, %v2269_v27 }
 0x2fb   : > { %v2271_v29 = vand.u32 4294901760, %v2270_v28 }
 0x2fd   : > { %3197 = vmatprep.subr.mxu1 %v2271_v29 }
 0x302   : > { %v2129_v31 = vpop.trf.xlu0 }
 0x303   : > { %v2146_v32 = vsel %vm2102_vm2, %v2129_v31, 0 }
 0x304   : > { %v2226_v33 = vand.u32 4294901760, %v2146_v32 }
 0x306   : > { %v2227_v34 = vsub.f32 %v2146_v32, %v2226_v33  ;;  %v2130_v36 = vpop.trf.xlu0 }
 0x307   : > { %v2149_v37 = vsel %vm2102_vm2, %v2130_v36, 0 }
 0x308   : > { %v2228_v38 = vand.u32 4294901760, %v2227_v34  ;;  %v2236_v40 = vand.u32 4294901760, %v2149_v37 }
 0x30a   : > { %v2237_v41 = vsub.f32 %v2149_v37, %v2236_v40  ;;  %v2131_v42 = vpop.trf.xlu0  ;;  %v2229_v43 = vsub.f32 %v2227_v34, %v2228_v38 }
 0x30b   : > { %v2152_v44 = vsel %vm2102_vm2, %v2131_v42, 0 }
 0x30c   : > { %v2238_v45 = vand.u32 4294901760, %v2237_v41  ;;  %v2246_v46 = vand.u32 4294901760, %v2152_v44  ;;  %v2230_v48 = vand.u32 4294901760, %v2229_v43 }
 0x30e   : > { %v2239_v50 = vsub.f32 %v2237_v41, %v2238_v45  ;;  %v2247_v51 = vsub.f32 %v2152_v44, %v2246_v46  ;;  %3191 = vmatprep.mubr.f32.mxu1 %v2230_v48  ;;  %v2132_v52 = vpop.trf.xlu0 }
 0x30f   : > { %v2155_v49 = vsel %vm2102_vm2, %v2132_v52, 0 }
 0x310   : > { %v2240_v53 = vand.u32 4294901760, %v2239_v50  ;;  %v2248_v54 = vand.u32 4294901760, %v2247_v51  ;;  %v2256_v47 = vand.u32 4294901760, %v2155_v49 }
 0x312   : > { %v2257_v55 = vsub.f32 %v2155_v49, %v2256_v47  ;;  %3192 = vmatmul.mubr.f32.vlgmr.msra.gmra.mrb[6].mxu1 %v2240_v53  ;;  %v2249_v56 = vsub.f32 %v2247_v51, %v2248_v54 }
 0x313   : > { %3198 = vmatpush3.xpose.msra.mxu1 %v2271_v29 }
 0x314   : > { %v2258_v35 = vand.u32 4294901760, %v2257_v55  ;;  %3205 = vmatprep.subr.mxu1 %v2268_v26  ;;  %v2250_v39 = vand.u32 4294901760, %v2249_v56 }
 0x316   : > { %3194 = vmatprep.mubr.f32.mxu1 %v2250_v39  ;;  %v2259_v57 = vsub.f32 %v2257_v55, %v2258_v35 }
 0x318   : > { %v2260_v58 = vand.u32 4294901760, %v2259_v57 }
 0x31a   : > { %3195 = vmatmul.mubr.f32.gmra.mrb[8].mxu1 %v2260_v58 }
 0x31b   : > { %3199 = vmatprep.mubr.f32.mxu1 %v2226_v33 }
 0x31e   : > { %3200 = vmatmul.mubr.f32.vlgmr.msra.gmra.mrb[6].mxu1 %v2236_v40 }
 0x31f   : > { %3206 = vmatpush3.xpose.msra.mxu1 %v2268_v26  ;;  %3202 = vmatprep.mubr.f32.mxu1 %v2246_v46 }
 0x320   : > { %3213 = vmatprep.subr.mxu1 %v2161_v25 }
 0x322   : > { %3203 = vmatmul.mubr.f32.gmra.mrb[8].mxu1 %v2256_v47 }
 0x323   : > { %3207 = vmatprep.mubr.f32.mxu1 %v2227_v34 }
 0x326   : > { %3208 = vmatmul.mubr.f32.vlgmr.msra.gmra.mrb[6].mxu1 %v2237_v41 }
 0x327   : > { %3214 = vmatpush3.xpose.msra.mxu1 %v2161_v25  ;;  %3210 = vmatprep.mubr.f32.mxu1 %v2247_v51 }
 0x328   : > { %3221 = vmatprep.subr.mxu1 %v2269_v27 }
 0x32a   : > { %3211 = vmatmul.mubr.f32.gmra.mrb[8].mxu1 %v2257_v55 }
 0x32b   : > { %3215 = vmatprep.mubr.f32.mxu1 %v2228_v38 }
 0x32e   : > { %3216 = vmatmul.mubr.f32.vlgmr.msra.gmra.mrb[6].mxu1 %v2238_v45 }
 0x32f   : > { %3222 = vmatpush3.xpose.msra.mxu1 %v2269_v27  ;;  %3218 = vmatprep.mubr.f32.mxu1 %v2248_v54 }
 0x330   : > { %3229 = vmatprep.subr.mxu1 %v2161_v25 }
 0x332   : > { %3219 = vmatmul.mubr.f32.gmra.mrb[8].mxu1 %v2258_v35 }
 0x333   : > { %3223 = vmatprep.mubr.f32.mxu1 %v2226_v33 }
 0x336   : > { %3224 = vmatmul.mubr.f32.vlgmr.msra.gmra.mrb[6].mxu1 %v2236_v40 }
 0x337   : > { %3230 = vmatpush3.xpose.msra.mxu1 %v2161_v25  ;;  %3226 = vmatprep.mubr.f32.mxu1 %v2246_v46 }
 0x33a   : > { %3227 = vmatmul.mubr.f32.gmra.mrb[8].mxu1 %v2256_v47 }
 0x33b   : > { %3231 = vmatprep.mubr.f32.mxu1 %v2226_v33 }
 0x33e   : > { %3232 = vmatmul.mubr.f32.vlgmr.msra.gmra.mrb[6].mxu1 %v2236_v40 }
 0x33f   : > { %3234 = vmatprep.mubr.f32.mxu1 %v2246_v46 }
 0x342   : > { %3235 = vmatmul.mubr.f32.gmra.mrb[8].mxu1 %v2256_v47 }
 0x380   : > { %v2111_v59 = vpop.xlane.xlu1 %2110 }
 0x381   : > { %3416 = vrcp.f32 %v2111_v59 }
 0x38b   : > { %v3417_v0 = vpop.eup %3416 }
 0x38c   : > { %v2741_v1 = vrot.slane %v3417_v0, %v2740_v63 }
 0x411   : > { %v3233_v3 = vpop.f32.mrb[6].mxu1 }
 0x412   : > { %v2756_v2 = vmul.f32 %v3233_v3, %v2741_v1  ;;  %v2713_v4 = vpop.f32.mrb[7].mxu1 }
 0x413   : > { %v2755_v5 = vmul.f32 %v2741_v1, %v2713_v4 }
 0x414   : > { %2760 = vst.msk [vmem:[%s140_s16 + $0x8] sm:$0xff] %vm2102_vm2, %v2756_v2 }
 0x415   : > { %2759 = vst.msk [vmem:[%s140_s16] sm:$0xff] %vm2102_vm2, %v2755_v5  ;;  %v3236_v30 = vpop.f32.mrb[8].mxu1 }
 0x416   : > { %v2758_v6 = vmul.f32 %v3236_v30, %v2741_v1  ;;  %v2725_v7 = vpop.f32.mrb[9].mxu1 }
 0x417   : > { %v2757_v8 = vmul.f32 %v2741_v1, %v2725_v7 }
 0x418   : > { %2762 = vst.msk [vmem:[%s140_s16 + $0x18] sm:$0xff] %vm2102_vm2, %v2758_v6 }
 0x419   : > { %2761 = vst.msk [vmem:[%s140_s16 + $0x10] sm:$0xff] %vm2102_vm2, %v2757_v8 }
 0x41a PF: > { %s12_s9 = sadd.s32 1, %s3424_s9  }
 0x41b   : > { %p9_p4 = scmp.ge.s32.totalorder %s12_s9, 4  }
 0x41d   :  { %11 = sbr.rel (!%p9_p4) target bundleno = 1 (0x1), region = 58 }

</bundles_post_ra>
